<compile_context>
chip_gen: v5e
topology: v5e:2x2
jax: 0.10.0
libtpu: 0.0.40
codegen_flags: <defaults>
</compile_context>

<pallas_src>
import functools

import numpy as np
import jax
import jax.numpy as jnp
from jax import lax
from jax.experimental import pallas as pl
from jax.experimental.pallas import tpu as pltpu


def _round_up(x, m):
    return ((x + m - 1) // m) * m


# ----------------------------- Pallas kernel -----------------------------

def rnn_fused_kernel(x_ref, wih_ref, whh_ref, b_ref, h0_ref, out_ref,
                     carry_ref, buf_ref, *,
                     alpha, num_layers, t_total, tile_t, compute_dtype):
    """All RNN layers over one (batch block, time tile) grid cell.

    x_ref:     (tile_T, tile_B, Dmax)  input tile (time-major, padded, compute dtype)
    wih_ref:   (L, Dmax, Hp)           stacked W_ih^T (zero padded)
    whh_ref:   (L, Hp, Hp)             stacked W_hh^T (zero padded)
    b_ref:     (L, 1, Hp)              stacked (b_ih + b_hh), f32
    h0_ref:    (L, tile_B, Hp)         initial hidden states for this batch block, f32
    out_ref:   (L, tile_B, Hp)         leaked final hidden states (written on last time tile)
    carry_ref: VMEM (L, tile_B, Hp) f32   per-layer hidden carry across time tiles
    buf_ref:   VMEM (tile_T, tile_B, Hp) f32  per-layer within-tile sequence buffer
    """
    t_idx = pl.program_id(1)
    n_t = pl.num_programs(1)
    tile_T, tile_B, Hp = buf_ref.shape
    rows = tile_T * tile_B
    d_in = x_ref.shape[2]
    need_mask = (t_total % tile_t) != 0   # static Python bool

    @pl.when(t_idx == 0)
    def _init_carry():
        carry_ref[...] = h0_ref[...]

    for l in range(num_layers):
        # ---- hoisted input projection for the whole tile: one large MXU matmul + one bias add
        if l == 0:
            inp = x_ref[...].astype(compute_dtype).reshape(rows, d_in)
            w_in = wih_ref[l].astype(compute_dtype)               # (Dmax, Hp)
        else:
            inp = buf_ref[...].reshape(rows, Hp).astype(compute_dtype)
            w_in = wih_ref[l][:Hp, :].astype(compute_dtype)       # (Hp, Hp)
        proj = jnp.dot(inp, w_in, preferred_element_type=jnp.float32) + b_ref[l]
        buf_ref[...] = proj.reshape(tile_T, tile_B, Hp)

        # ---- serial recurrence: h carried in vregs (fori_loop value), not VMEM scratch
        whh_l = whh_ref[l].astype(compute_dtype)                  # (Hp, Hp)

        def step(t, h, whh_l=whh_l):
            pre = buf_ref[t] + jnp.dot(h.astype(compute_dtype), whh_l,
                                       preferred_element_type=jnp.float32)
            h_new = jnp.tanh(pre)
            if need_mask:   # only emitted when T was padded up to a tile multiple
                valid = (t_idx * tile_t + t) < t_total
                h_new = jnp.where(valid, h_new, h)
            buf_ref[t] = h_new       # layer output becomes input of layer l+1 (stays in VMEM)
            return h_new

        h_fin = lax.fori_loop(0, tile_T, step, carry_ref[l],
                              unroll=True if tile_T <= 32 else 8)
        carry_ref[l] = h_fin

    @pl.when(t_idx == n_t - 1)
    def _finish():
        # fused leakage epilogue: ht = alpha*h0 + (1-alpha)*ht
        out_ref[...] = alpha * h0_ref[...] + (1.0 - alpha) * carry_ref[...]


# ----------------------------- JAX wrapper --------------------------------

def rnn_model_forward(x, model, h0=None, leakage_rate=0.3):
    """Forward pass matching RNNModel.forward for batched x: (B, T, input_size)."""
    wih, whh, bias = model["wih"], model["whh"], model["bias"]
    L = model["num_layers"]
    H = model["hidden_size"]
    Hp = model["hidden_p"]
    Dmax = model["d_max"]
    compute_dtype = model["compute_dtype"]

    B, T, Din = x.shape
    Bp0 = _round_up(B, 8)
    tile_B = Bp0 if Bp0 <= 64 else 64       # >1 batch blocks shard across cores (v7x)
    Bp = _round_up(Bp0, tile_B)
    tile_T = min(T, 128)                    # modest tile: fits v7x VMEM, still DMA-hidden
    Tp = _round_up(T, tile_T)

    # time-major, zero-padded, matmul operand dtype
    x_tm = jnp.transpose(x, (1, 0, 2)).astype(compute_dtype)              # (T, B, Din)
    x_pad = jnp.zeros((Tp, Bp, Dmax), compute_dtype).at[:T, :B, :Din].set(x_tm)

    if h0 is None:
        h0_pad = jnp.zeros((L, Bp, Hp), jnp.float32)
    else:
        h0_pad = jnp.zeros((L, Bp, Hp), jnp.float32).at[:, :B, :H].set(
            h0.astype(jnp.float32))

    # explicit VMEM budget (double-buffered inputs + scratch), capped for v7x's 64 MiB
    cbytes = jnp.dtype(compute_dtype).itemsize
    vmem_est = (2 * tile_T * tile_B * Dmax * cbytes        # x tile (double buffered)
                + 2 * L * Dmax * Hp * cbytes               # W_ih^T
                + 2 * L * Hp * Hp * cbytes                 # W_hh^T
                + 2 * L * 8 * Hp * 4                       # bias (sublane padded)
                + 4 * L * tile_B * Hp * 4                  # h0 + out blocks
                + L * tile_B * Hp * 4                      # carry scratch
                + tile_T * tile_B * Hp * 4)                # tile sequence buffer scratch
    vmem_limit = int(min(max(2 * vmem_est, 8 * 1024 * 1024), 48 * 1024 * 1024))

    kernel = functools.partial(
        rnn_fused_kernel, alpha=float(leakage_rate), num_layers=L,
        t_total=T, tile_t=tile_T, compute_dtype=compute_dtype)

    ht_pad = pl.pallas_call(
        kernel,
        out_shape=jax.ShapeDtypeStruct((L, Bp, Hp), jnp.float32),
        grid_spec=pltpu.PrefetchScalarGridSpec(
            num_scalar_prefetch=0,
            grid=(Bp // tile_B, Tp // tile_T),
            in_specs=[
                pl.BlockSpec((tile_T, tile_B, Dmax), lambda b, t: (t, b, 0)),
                pl.BlockSpec((L, Dmax, Hp), lambda b, t: (0, 0, 0)),
                pl.BlockSpec((L, Hp, Hp), lambda b, t: (0, 0, 0)),
                pl.BlockSpec((L, 1, Hp), lambda b, t: (0, 0, 0)),
                pl.BlockSpec((L, tile_B, Hp), lambda b, t: (0, b, 0)),
            ],
            out_specs=pl.BlockSpec((L, tile_B, Hp), lambda b, t: (0, b, 0)),
            scratch_shapes=[
                pltpu.VMEM((L, tile_B, Hp), jnp.float32),        # hidden carry
                pltpu.VMEM((tile_T, tile_B, Hp), jnp.float32),   # per-layer tile buffer
            ]),
        compiler_params=pltpu.CompilerParams(
            dimension_semantics=("parallel", "arbitrary"),
            vmem_limit_bytes=vmem_limit),
    )(x_pad, wih, whh, bias, h0_pad)

    ht = ht_pad[:, :B, :H]
    return ht[-1], ht


# ----------------------------- Parameter init ------------------------------

def init_params(input_size, hidden_size, num_layers, init_range,
                spectral_radius, density, input_scaling, seed=0):
    """Deterministic init mimicking RNNModel.init_weights (ESN-style), host-side NumPy."""
    rng = np.random.RandomState(seed)
    lo, hi = init_range
    params = []
    for l in range(num_layers):
        din = input_size if l == 0 else hidden_size
        w_ih = rng.uniform(lo, hi, (hidden_size, din)).astype(np.float32)
        w_hh = rng.uniform(lo, hi, (hidden_size, hidden_size)).astype(np.float32)
        b_ih = rng.uniform(lo, hi, (hidden_size,)).astype(np.float32)
        b_hh = rng.uniform(lo, hi, (hidden_size,)).astype(np.float32)

        w_ih = w_ih * input_scaling                       # input scaling on weight_ih_l{k}

        if density < 1:                                   # sparsify weight_hh_l{k}
            n = hidden_size * hidden_size
            zero_idx = rng.permutation(n)[: int(n * (1 - density))]
            w_flat = w_hh.reshape(-1)
            w_flat[zero_idx] = 0.0
            w_hh = w_flat.reshape(hidden_size, hidden_size)

        if spectral_radius > 0:                           # rescale to spectral radius
            abs_ev = np.abs(np.linalg.eigvals(w_hh.astype(np.float64)))
            w_hh = (w_hh * (spectral_radius / np.max(abs_ev))).astype(np.float32)

        params.append(dict(
            wih_t=w_ih.T.copy(),                 # (Din, H)
            whh_t=w_hh.T.copy(),                 # (H, H)
            b=(b_ih + b_hh)[None, :].copy(),     # (1, H)
        ))
    return params


def pack_params(params, compute_dtype=jnp.bfloat16):
    """Pad + stack per-layer weights into lane-dense (8,128)-aligned device arrays."""
    L = len(params)
    H = params[0]["whh_t"].shape[0]
    Din0 = params[0]["wih_t"].shape[0]
    Hp = _round_up(H, 128)
    Dmax = max(_round_up(Din0, 128), Hp)

    wih = np.zeros((L, Dmax, Hp), np.float32)
    whh = np.zeros((L, Hp, Hp), np.float32)
    bias = np.zeros((L, 1, Hp), np.float32)
    for l, p in enumerate(params):
        wt = np.asarray(p["wih_t"], np.float32)
        wih[l, :wt.shape[0], :H] = wt
        whh[l, :H, :H] = np.asarray(p["whh_t"], np.float32)
        bias[l, 0, :H] = np.asarray(p["b"], np.float32).reshape(-1)

    return dict(
        wih=jnp.asarray(wih, compute_dtype),   # MXU operands in compute dtype (bf16)
        whh=jnp.asarray(whh, compute_dtype),
        bias=jnp.asarray(bias, jnp.float32),   # bias added in f32
        num_layers=L, hidden_size=H, hidden_p=Hp, d_max=Dmax,
        compute_dtype=compute_dtype)


# ----------------------------- Pure-JAX reference ---------------------------

def rnn_model_reference(x, params, h0=None, leakage_rate=0.3):
    B, T, _ = x.shape
    L = len(params)
    H = params[0]["whh_t"].shape[0]
    if h0 is None:
        h0 = jnp.zeros((L, B, H), jnp.float32)
    layer_in = jnp.transpose(x, (1, 0, 2)).astype(jnp.float32)
    finals = []
    for l in range(L):
        wih = jnp.asarray(params[l]["wih_t"], jnp.float32)
        whh = jnp.asarray(params[l]["whh_t"], jnp.float32)
        b = jnp.asarray(params[l]["b"], jnp.float32)
        h = h0[l]
        outs = []
        for t in range(T):
            h = jnp.tanh(layer_in[t] @ wih + h @ whh + b)
            outs.append(h)
        layer_in = jnp.stack(outs, axis=0)
        finals.append(h)
    ht = jnp.stack(finals, axis=0)
    ht = leakage_rate * h0 + (1 - leakage_rate) * ht
    return ht[-1], ht


# --------------------------------- main -------------------------------------

if __name__ == "__main__":
    input_size, hidden_size, num_layers = 4, 32, 2
    batch, seq = 2, 8
    init_range = (-0.5, 0.5)
    spectral_radius = 0.9
    leakage_rate = 0.3
    density = 0.5
    input_scaling = 1.0

    params = init_params(input_size, hidden_size, num_layers, init_range,
                         spectral_radius, density, input_scaling, seed=0)
    model = pack_params(params, compute_dtype=jnp.bfloat16)

    key = jax.random.PRNGKey(0)
    x = jax.random.normal(key, (batch, seq, input_size), dtype=jnp.float32)

    h_last, ht = rnn_model_forward(x, model, h0=None, leakage_rate=leakage_rate)
    jax.block_until_ready((h_last, ht))

    assert h_last.shape == (batch, hidden_size)
    assert ht.shape == (num_layers, batch, hidden_size)

    # loose correctness check vs pure-JAX f32 reference (kernel uses bf16 MXU operands)
    h_last_ref, ht_ref = rnn_model_reference(x, params, h0=None, leakage_rate=leakage_rate)
    max_err = float(jnp.max(jnp.abs(ht - ht_ref)))
    assert max_err < 0.1, f"max abs error vs reference too large: {max_err}"

    print("KERNEL_OK")
</pallas_src>

<mosaic_0001>
module attributes {stable_mosaic.version = 11 : i64} {
  func.func @rnn_fused_kernel(%arg0: i32, %arg1: i32, %arg2: memref<8x8x128xbf16, #tpu.memory_space<vmem>>, %arg3: memref<2x128x128xbf16, #tpu.memory_space<vmem>>, %arg4: memref<2x128x128xbf16, #tpu.memory_space<vmem>>, %arg5: memref<2x1x128xf32, #tpu.memory_space<vmem>>, %arg6: memref<2x8x128xf32, #tpu.memory_space<vmem>>, %arg7: memref<2x8x128xf32, #tpu.memory_space<vmem>>, %arg8: memref<2x8x128xf32, #tpu.memory_space<vmem>>, %arg9: memref<8x8x128xf32, #tpu.memory_space<vmem>>) attributes {dimension_semantics = [#tpu.dimension_semantics<parallel>, #tpu.dimension_semantics<arbitrary>], iteration_bounds = array<i64: 1, 1>, scalar_prefetch = 0 : i64, scratch_operands = 2 : i64, tpu.core_type = #tpu.core_type<tc>, window_params = [{transform_indices = @transform_0, window_bounds = array<i64: 8, 8, 128>}, {pipeline_mode = #tpu.pipeline_mode<synchronous>, transform_indices = @transform_1, window_bounds = array<i64: 2, 128, 128>}, {pipeline_mode = #tpu.pipeline_mode<synchronous>, transform_indices = @transform_2, window_bounds = array<i64: 2, 128, 128>}, {pipeline_mode = #tpu.pipeline_mode<synchronous>, transform_indices = @transform_3, window_bounds = array<i64: 2, 1, 128>}, {transform_indices = @transform_4, window_bounds = array<i64: 2, 8, 128>}, {transform_indices = @transform_5, window_bounds = array<i64: 2, 8, 128>}]} {
    %c0_i32 = arith.constant 0 : i32
    %0 = arith.cmpi eq, %arg1, %c0_i32 : i32
    %1 = arith.extui %0 : i1 to i32
    %c0_i32_0 = arith.constant 0 : i32
    %2 = arith.cmpi ne, %1, %c0_i32_0 : i32
    scf.if %2 {
      %c0_134 = arith.constant 0 : index
      %c0_135 = arith.constant 0 : index
      %c0_136 = arith.constant 0 : index
      %219 = vector.load %arg6[%c0_134, %c0_135, %c0_136] : memref<2x8x128xf32, #tpu.memory_space<vmem>>, vector<2x8x128xf32>
      %c0_137 = arith.constant 0 : index
      %c0_138 = arith.constant 0 : index
      %c0_139 = arith.constant 0 : index
      %220 = vector.load %arg8[%c0_137, %c0_138, %c0_139] : memref<2x8x128xf32, #tpu.memory_space<vmem>>, vector<2x8x128xf32>
      tpu.vector_store %arg8[%c0_137, %c0_138, %c0_139], %219 {strides = array<i32>} : memref<2x8x128xf32, #tpu.memory_space<vmem>>, vector<2x8x128xf32>,
    } else {
    }
    %c0 = arith.constant 0 : index
    %c0_1 = arith.constant 0 : index
    %c0_2 = arith.constant 0 : index
    %3 = vector.load %arg2[%c0, %c0_1, %c0_2] : memref<8x8x128xbf16, #tpu.memory_space<vmem>>, vector<8x8x128xbf16>
    %4 = vector.shape_cast %3 : vector<8x8x128xbf16> to vector<64x128xbf16>
    %c0_3 = arith.constant 0 : index
    %c0_4 = arith.constant 0 : index
    %c0_5 = arith.constant 0 : index
    %5 = vector.load %arg3[%c0_3, %c0_4, %c0_5] : memref<2x128x128xbf16, #tpu.memory_space<vmem>>, vector<1x128x128xbf16>
    %6 = vector.shape_cast %5 : vector<1x128x128xbf16> to vector<128x128xbf16>
    %cst = arith.constant dense<0.000000e+00> : vector<64x128xf32>
    %7 = tpu.matmul %4, %6, %cst {dimension_numbers = #tpu.dot_dimension_numbers<[1], [0], [0], [1], [0, 0, 1, 1], [], []>} : vector<64x128xbf16>, vector<128x128xbf16>, vector<64x128xf32> -> vector<64x128xf32>
    %c0_6 = arith.constant 0 : index
    %c0_7 = arith.constant 0 : index
    %c0_8 = arith.constant 0 : index
    %8 = vector.load %arg5[%c0_6, %c0_7, %c0_8] : memref<2x1x128xf32, #tpu.memory_space<vmem>>, vector<1x1x128xf32>
    %9 = vector.shape_cast %8 : vector<1x1x128xf32> to vector<1x128xf32>
    %10 = vector.broadcast %9 : vector<1x128xf32> to vector<64x128xf32>
    %11 = arith.addf %7, %10 : vector<64x128xf32>
    %12 = vector.shape_cast %11 : vector<64x128xf32> to vector<8x8x128xf32>
    %c0_9 = arith.constant 0 : index
    %c0_10 = arith.constant 0 : index
    %c0_11 = arith.constant 0 : index
    %13 = vector.load %arg9[%c0_9, %c0_10, %c0_11] : memref<8x8x128xf32, #tpu.memory_space<vmem>>, vector<8x8x128xf32>
    tpu.vector_store %arg9[%c0_9, %c0_10, %c0_11], %12 {strides = array<i32>} : memref<8x8x128xf32, #tpu.memory_space<vmem>>, vector<8x8x128xf32>,
    %c0_12 = arith.constant 0 : index
    %c0_13 = arith.constant 0 : index
    %c0_14 = arith.constant 0 : index
    %14 = vector.load %arg4[%c0_12, %c0_13, %c0_14] : memref<2x128x128xbf16, #tpu.memory_space<vmem>>, vector<1x128x128xbf16>
    %15 = vector.shape_cast %14 : vector<1x128x128xbf16> to vector<128x128xbf16>
    %c0_15 = arith.constant 0 : index
    %c0_16 = arith.constant 0 : index
    %c0_17 = arith.constant 0 : index
    %16 = vector.load %arg8[%c0_15, %c0_16, %c0_17] : memref<2x8x128xf32, #tpu.memory_space<vmem>>, vector<1x8x128xf32>
    %17 = vector.shape_cast %16 : vector<1x8x128xf32> to vector<8x128xf32>
    %c0_i32_18 = arith.constant 0 : i32
    %18 = arith.index_cast %c0_i32_18 : i32 to index
    %c0_19 = arith.constant 0 : index
    %c0_20 = arith.constant 0 : index
    %19 = vector.load %arg9[%18, %c0_19, %c0_20] : memref<8x8x128xf32, #tpu.memory_space<vmem>>, vector<1x8x128xf32>
    %20 = vector.shape_cast %19 : vector<1x8x128xf32> to vector<8x128xf32>
    %21 = arith.truncf %17 : vector<8x128xf32> to vector<8x128xbf16>
    %cst_21 = arith.constant dense<0.000000e+00> : vector<8x128xf32>
    %22 = tpu.matmul %21, %15, %cst_21 {dimension_numbers = #tpu.dot_dimension_numbers<[1], [0], [0], [1], [0, 0, 1, 1], [], []>} : vector<8x128xbf16>, vector<128x128xbf16>, vector<8x128xf32> -> vector<8x128xf32>
    %23 = arith.addf %20, %22 : vector<8x128xf32>
    %24 = math.tanh %23 : vector<8x128xf32>
    %25 = arith.index_cast %c0_i32_18 : i32 to index
    %c0_22 = arith.constant 0 : index
    %c0_23 = arith.constant 0 : index
    %26 = vector.load %arg9[%25, %c0_22, %c0_23] : memref<8x8x128xf32, #tpu.memory_space<vmem>>, vector<1x8x128xf32>
    %27 = vector.shape_cast %26 : vector<1x8x128xf32> to vector<8x128xf32>
    %28 = vector.shape_cast %24 : vector<8x128xf32> to vector<1x8x128xf32>
    tpu.vector_store %arg9[%25, %c0_22, %c0_23], %28 {strides = array<i32>} : memref<8x8x128xf32, #tpu.memory_space<vmem>>, vector<1x8x128xf32>,
    %c1_i32 = arith.constant 1 : i32
    %29 = arith.index_cast %c1_i32 : i32 to index
    %c0_24 = arith.constant 0 : index
    %c0_25 = arith.constant 0 : index
    %30 = vector.load %arg9[%29, %c0_24, %c0_25] : memref<8x8x128xf32, #tpu.memory_space<vmem>>, vector<1x8x128xf32>
    %31 = vector.shape_cast %30 : vector<1x8x128xf32> to vector<8x128xf32>
    %32 = arith.truncf %24 : vector<8x128xf32> to vector<8x128xbf16>
    %cst_26 = arith.constant dense<0.000000e+00> : vector<8x128xf32>
    %33 = tpu.matmul %32, %15, %cst_26 {dimension_numbers = #tpu.dot_dimension_numbers<[1], [0], [0], [1], [0, 0, 1, 1], [], []>} : vector<8x128xbf16>, vector<128x128xbf16>, vector<8x128xf32> -> vector<8x128xf32>
    %34 = arith.addf %31, %33 : vector<8x128xf32>
    %35 = math.tanh %34 : vector<8x128xf32>
    %36 = arith.index_cast %c1_i32 : i32 to index
    %c0_27 = arith.constant 0 : index
    %c0_28 = arith.constant 0 : index
    %37 = vector.load %arg9[%36, %c0_27, %c0_28] : memref<8x8x128xf32, #tpu.memory_space<vmem>>, vector<1x8x128xf32>
    %38 = vector.shape_cast %37 : vector<1x8x128xf32> to vector<8x128xf32>
    %39 = vector.shape_cast %35 : vector<8x128xf32> to vector<1x8x128xf32>
    tpu.vector_store %arg9[%36, %c0_27, %c0_28], %39 {strides = array<i32>} : memref<8x8x128xf32, #tpu.memory_space<vmem>>, vector<1x8x128xf32>,
    %c2_i32 = arith.constant 2 : i32
    %40 = arith.index_cast %c2_i32 : i32 to index
    %c0_29 = arith.constant 0 : index
    %c0_30 = arith.constant 0 : index
    %41 = vector.load %arg9[%40, %c0_29, %c0_30] : memref<8x8x128xf32, #tpu.memory_space<vmem>>, vector<1x8x128xf32>
    %42 = vector.shape_cast %41 : vector<1x8x128xf32> to vector<8x128xf32>
    %43 = arith.truncf %35 : vector<8x128xf32> to vector<8x128xbf16>
    %cst_31 = arith.constant dense<0.000000e+00> : vector<8x128xf32>
    %44 = tpu.matmul %43, %15, %cst_31 {dimension_numbers = #tpu.dot_dimension_numbers<[1], [0], [0], [1], [0, 0, 1, 1], [], []>} : vector<8x128xbf16>, vector<128x128xbf16>, vector<8x128xf32> -> vector<8x128xf32>
    %45 = arith.addf %42, %44 : vector<8x128xf32>
    %46 = math.tanh %45 : vector<8x128xf32>
    %47 = arith.index_cast %c2_i32 : i32 to index
    %c0_32 = arith.constant 0 : index
    %c0_33 = arith.constant 0 : index
    %48 = vector.load %arg9[%47, %c0_32, %c0_33] : memref<8x8x128xf32, #tpu.memory_space<vmem>>, vector<1x8x128xf32>
    %49 = vector.shape_cast %48 : vector<1x8x128xf32> to vector<8x128xf32>
    %50 = vector.shape_cast %46 : vector<8x128xf32> to vector<1x8x128xf32>
    tpu.vector_store %arg9[%47, %c0_32, %c0_33], %50 {strides = array<i32>} : memref<8x8x128xf32, #tpu.memory_space<vmem>>, vector<1x8x128xf32>,
    %c3_i32 = arith.constant 3 : i32
    %51 = arith.index_cast %c3_i32 : i32 to index
    %c0_34 = arith.constant 0 : index
    %c0_35 = arith.constant 0 : index
    %52 = vector.load %arg9[%51, %c0_34, %c0_35] : memref<8x8x128xf32, #tpu.memory_space<vmem>>, vector<1x8x128xf32>
    %53 = vector.shape_cast %52 : vector<1x8x128xf32> to vector<8x128xf32>
    %54 = arith.truncf %46 : vector<8x128xf32> to vector<8x128xbf16>
    %cst_36 = arith.constant dense<0.000000e+00> : vector<8x128xf32>
    %55 = tpu.matmul %54, %15, %cst_36 {dimension_numbers = #tpu.dot_dimension_numbers<[1], [0], [0], [1], [0, 0, 1, 1], [], []>} : vector<8x128xbf16>, vector<128x128xbf16>, vector<8x128xf32> -> vector<8x128xf32>
    %56 = arith.addf %53, %55 : vector<8x128xf32>
    %57 = math.tanh %56 : vector<8x128xf32>
    %58 = arith.index_cast %c3_i32 : i32 to index
    %c0_37 = arith.constant 0 : index
    %c0_38 = arith.constant 0 : index
    %59 = vector.load %arg9[%58, %c0_37, %c0_38] : memref<8x8x128xf32, #tpu.memory_space<vmem>>, vector<1x8x128xf32>
    %60 = vector.shape_cast %59 : vector<1x8x128xf32> to vector<8x128xf32>
    %61 = vector.shape_cast %57 : vector<8x128xf32> to vector<1x8x128xf32>
    tpu.vector_store %arg9[%58, %c0_37, %c0_38], %61 {strides = array<i32>} : memref<8x8x128xf32, #tpu.memory_space<vmem>>, vector<1x8x128xf32>,
    %c4_i32 = arith.constant 4 : i32
    %62 = arith.index_cast %c4_i32 : i32 to index
    %c0_39 = arith.constant 0 : index
    %c0_40 = arith.constant 0 : index
    %63 = vector.load %arg9[%62, %c0_39, %c0_40] : memref<8x8x128xf32, #tpu.memory_space<vmem>>, vector<1x8x128xf32>
    %64 = vector.shape_cast %63 : vector<1x8x128xf32> to vector<8x128xf32>
    %65 = arith.truncf %57 : vector<8x128xf32> to vector<8x128xbf16>
    %cst_41 = arith.constant dense<0.000000e+00> : vector<8x128xf32>
    %66 = tpu.matmul %65, %15, %cst_41 {dimension_numbers = #tpu.dot_dimension_numbers<[1], [0], [0], [1], [0, 0, 1, 1], [], []>} : vector<8x128xbf16>, vector<128x128xbf16>, vector<8x128xf32> -> vector<8x128xf32>
    %67 = arith.addf %64, %66 : vector<8x128xf32>
    %68 = math.tanh %67 : vector<8x128xf32>
    %69 = arith.index_cast %c4_i32 : i32 to index
    %c0_42 = arith.constant 0 : index
    %c0_43 = arith.constant 0 : index
    %70 = vector.load %arg9[%69, %c0_42, %c0_43] : memref<8x8x128xf32, #tpu.memory_space<vmem>>, vector<1x8x128xf32>
    %71 = vector.shape_cast %70 : vector<1x8x128xf32> to vector<8x128xf32>
    %72 = vector.shape_cast %68 : vector<8x128xf32> to vector<1x8x128xf32>
    tpu.vector_store %arg9[%69, %c0_42, %c0_43], %72 {strides = array<i32>} : memref<8x8x128xf32, #tpu.memory_space<vmem>>, vector<1x8x128xf32>,
    %c5_i32 = arith.constant 5 : i32
    %73 = arith.index_cast %c5_i32 : i32 to index
    %c0_44 = arith.constant 0 : index
    %c0_45 = arith.constant 0 : index
    %74 = vector.load %arg9[%73, %c0_44, %c0_45] : memref<8x8x128xf32, #tpu.memory_space<vmem>>, vector<1x8x128xf32>
    %75 = vector.shape_cast %74 : vector<1x8x128xf32> to vector<8x128xf32>
    %76 = arith.truncf %68 : vector<8x128xf32> to vector<8x128xbf16>
    %cst_46 = arith.constant dense<0.000000e+00> : vector<8x128xf32>
    %77 = tpu.matmul %76, %15, %cst_46 {dimension_numbers = #tpu.dot_dimension_numbers<[1], [0], [0], [1], [0, 0, 1, 1], [], []>} : vector<8x128xbf16>, vector<128x128xbf16>, vector<8x128xf32> -> vector<8x128xf32>
    %78 = arith.addf %75, %77 : vector<8x128xf32>
    %79 = math.tanh %78 : vector<8x128xf32>
    %80 = arith.index_cast %c5_i32 : i32 to index
    %c0_47 = arith.constant 0 : index
    %c0_48 = arith.constant 0 : index
    %81 = vector.load %arg9[%80, %c0_47, %c0_48] : memref<8x8x128xf32, #tpu.memory_space<vmem>>, vector<1x8x128xf32>
    %82 = vector.shape_cast %81 : vector<1x8x128xf32> to vector<8x128xf32>
    %83 = vector.shape_cast %79 : vector<8x128xf32> to vector<1x8x128xf32>
    tpu.vector_store %arg9[%80, %c0_47, %c0_48], %83 {strides = array<i32>} : memref<8x8x128xf32, #tpu.memory_space<vmem>>, vector<1x8x128xf32>,
    %c6_i32 = arith.constant 6 : i32
    %84 = arith.index_cast %c6_i32 : i32 to index
    %c0_49 = arith.constant 0 : index
    %c0_50 = arith.constant 0 : index
    %85 = vector.load %arg9[%84, %c0_49, %c0_50] : memref<8x8x128xf32, #tpu.memory_space<vmem>>, vector<1x8x128xf32>
    %86 = vector.shape_cast %85 : vector<1x8x128xf32> to vector<8x128xf32>
    %87 = arith.truncf %79 : vector<8x128xf32> to vector<8x128xbf16>
    %cst_51 = arith.constant dense<0.000000e+00> : vector<8x128xf32>
    %88 = tpu.matmul %87, %15, %cst_51 {dimension_numbers = #tpu.dot_dimension_numbers<[1], [0], [0], [1], [0, 0, 1, 1], [], []>} : vector<8x128xbf16>, vector<128x128xbf16>, vector<8x128xf32> -> vector<8x128xf32>
    %89 = arith.addf %86, %88 : vector<8x128xf32>
    %90 = math.tanh %89 : vector<8x128xf32>
    %91 = arith.index_cast %c6_i32 : i32 to index
    %c0_52 = arith.constant 0 : index
    %c0_53 = arith.constant 0 : index
    %92 = vector.load %arg9[%91, %c0_52, %c0_53] : memref<8x8x128xf32, #tpu.memory_space<vmem>>, vector<1x8x128xf32>
    %93 = vector.shape_cast %92 : vector<1x8x128xf32> to vector<8x128xf32>
    %94 = vector.shape_cast %90 : vector<8x128xf32> to vector<1x8x128xf32>
    tpu.vector_store %arg9[%91, %c0_52, %c0_53], %94 {strides = array<i32>} : memref<8x8x128xf32, #tpu.memory_space<vmem>>, vector<1x8x128xf32>,
    %c7_i32 = arith.constant 7 : i32
    %95 = arith.index_cast %c7_i32 : i32 to index
    %c0_54 = arith.constant 0 : index
    %c0_55 = arith.constant 0 : index
    %96 = vector.load %arg9[%95, %c0_54, %c0_55] : memref<8x8x128xf32, #tpu.memory_space<vmem>>, vector<1x8x128xf32>
    %97 = vector.shape_cast %96 : vector<1x8x128xf32> to vector<8x128xf32>
    %98 = arith.truncf %90 : vector<8x128xf32> to vector<8x128xbf16>
    %cst_56 = arith.constant dense<0.000000e+00> : vector<8x128xf32>
    %99 = tpu.matmul %98, %15, %cst_56 {dimension_numbers = #tpu.dot_dimension_numbers<[1], [0], [0], [1], [0, 0, 1, 1], [], []>} : vector<8x128xbf16>, vector<128x128xbf16>, vector<8x128xf32> -> vector<8x128xf32>
    %100 = arith.addf %97, %99 : vector<8x128xf32>
    %101 = math.tanh %100 : vector<8x128xf32>
    %102 = arith.index_cast %c7_i32 : i32 to index
    %c0_57 = arith.constant 0 : index
    %c0_58 = arith.constant 0 : index
    %103 = vector.load %arg9[%102, %c0_57, %c0_58] : memref<8x8x128xf32, #tpu.memory_space<vmem>>, vector<1x8x128xf32>
    %104 = vector.shape_cast %103 : vector<1x8x128xf32> to vector<8x128xf32>
    %105 = vector.shape_cast %101 : vector<8x128xf32> to vector<1x8x128xf32>
    tpu.vector_store %arg9[%102, %c0_57, %c0_58], %105 {strides = array<i32>} : memref<8x8x128xf32, #tpu.memory_space<vmem>>, vector<1x8x128xf32>,
    %c8_i32 = arith.constant 8 : i32
    %c0_59 = arith.constant 0 : index
    %c0_60 = arith.constant 0 : index
    %c0_61 = arith.constant 0 : index
    %106 = vector.load %arg8[%c0_59, %c0_60, %c0_61] : memref<2x8x128xf32, #tpu.memory_space<vmem>>, vector<1x8x128xf32>
    %107 = vector.shape_cast %106 : vector<1x8x128xf32> to vector<8x128xf32>
    %108 = vector.shape_cast %101 : vector<8x128xf32> to vector<1x8x128xf32>
    tpu.vector_store %arg8[%c0_59, %c0_60, %c0_61], %108 {strides = array<i32>} : memref<2x8x128xf32, #tpu.memory_space<vmem>>, vector<1x8x128xf32>,
    %c0_62 = arith.constant 0 : index
    %c0_63 = arith.constant 0 : index
    %c0_64 = arith.constant 0 : index
    %109 = vector.load %arg9[%c0_62, %c0_63, %c0_64] : memref<8x8x128xf32, #tpu.memory_space<vmem>>, vector<8x8x128xf32>
    %110 = vector.shape_cast %109 : vector<8x8x128xf32> to vector<64x128xf32>
    %111 = arith.truncf %110 : vector<64x128xf32> to vector<64x128xbf16>
    %c1 = arith.constant 1 : index
    %c0_65 = arith.constant 0 : index
    %c0_66 = arith.constant 0 : index
    %112 = vector.load %arg3[%c1, %c0_65, %c0_66] : memref<2x128x128xbf16, #tpu.memory_space<vmem>>, vector<1x128x128xbf16>
    %113 = vector.shape_cast %112 : vector<1x128x128xbf16> to vector<128x128xbf16>
    %cst_67 = arith.constant dense<0.000000e+00> : vector<64x128xf32>
    %114 = tpu.matmul %111, %113, %cst_67 {dimension_numbers = #tpu.dot_dimension_numbers<[1], [0], [0], [1], [0, 0, 1, 1], [], []>} : vector<64x128xbf16>, vector<128x128xbf16>, vector<64x128xf32> -> vector<64x128xf32>
    %c1_68 = arith.constant 1 : index
    %c0_69 = arith.constant 0 : index
    %c0_70 = arith.constant 0 : index
    %115 = vector.load %arg5[%c1_68, %c0_69, %c0_70] : memref<2x1x128xf32, #tpu.memory_space<vmem>>, vector<1x1x128xf32>
    %116 = vector.shape_cast %115 : vector<1x1x128xf32> to vector<1x128xf32>
    %117 = vector.broadcast %116 : vector<1x128xf32> to vector<64x128xf32>
    %118 = arith.addf %114, %117 : vector<64x128xf32>
    %119 = vector.shape_cast %118 : vector<64x128xf32> to vector<8x8x128xf32>
    %c0_71 = arith.constant 0 : index
    %c0_72 = arith.constant 0 : index
    %c0_73 = arith.constant 0 : index
    %120 = vector.load %arg9[%c0_71, %c0_72, %c0_73] : memref<8x8x128xf32, #tpu.memory_space<vmem>>, vector<8x8x128xf32>
    tpu.vector_store %arg9[%c0_71, %c0_72, %c0_73], %119 {strides = array<i32>} : memref<8x8x128xf32, #tpu.memory_space<vmem>>, vector<8x8x128xf32>,
    %c1_74 = arith.constant 1 : index
    %c0_75 = arith.constant 0 : index
    %c0_76 = arith.constant 0 : index
    %121 = vector.load %arg4[%c1_74, %c0_75, %c0_76] : memref<2x128x128xbf16, #tpu.memory_space<vmem>>, vector<1x128x128xbf16>
    %122 = vector.shape_cast %121 : vector<1x128x128xbf16> to vector<128x128xbf16>
    %c1_77 = arith.constant 1 : index
    %c0_78 = arith.constant 0 : index
    %c0_79 = arith.constant 0 : index
    %123 = vector.load %arg8[%c1_77, %c0_78, %c0_79] : memref<2x8x128xf32, #tpu.memory_space<vmem>>, vector<1x8x128xf32>
    %124 = vector.shape_cast %123 : vector<1x8x128xf32> to vector<8x128xf32>
    %c0_i32_80 = arith.constant 0 : i32
    %125 = arith.index_cast %c0_i32_80 : i32 to index
    %c0_81 = arith.constant 0 : index
    %c0_82 = arith.constant 0 : index
    %126 = vector.load %arg9[%125, %c0_81, %c0_82] : memref<8x8x128xf32, #tpu.memory_space<vmem>>, vector<1x8x128xf32>
    %127 = vector.shape_cast %126 : vector<1x8x128xf32> to vector<8x128xf32>
    %128 = arith.truncf %124 : vector<8x128xf32> to vector<8x128xbf16>
    %cst_83 = arith.constant dense<0.000000e+00> : vector<8x128xf32>
    %129 = tpu.matmul %128, %122, %cst_83 {dimension_numbers = #tpu.dot_dimension_numbers<[1], [0], [0], [1], [0, 0, 1, 1], [], []>} : vector<8x128xbf16>, vector<128x128xbf16>, vector<8x128xf32> -> vector<8x128xf32>
    %130 = arith.addf %127, %129 : vector<8x128xf32>
    %131 = math.tanh %130 : vector<8x128xf32>
    %132 = arith.index_cast %c0_i32_80 : i32 to index
    %c0_84 = arith.constant 0 : index
    %c0_85 = arith.constant 0 : index
    %133 = vector.load %arg9[%132, %c0_84, %c0_85] : memref<8x8x128xf32, #tpu.memory_space<vmem>>, vector<1x8x128xf32>
    %134 = vector.shape_cast %133 : vector<1x8x128xf32> to vector<8x128xf32>
    %135 = vector.shape_cast %131 : vector<8x128xf32> to vector<1x8x128xf32>
    tpu.vector_store %arg9[%132, %c0_84, %c0_85], %135 {strides = array<i32>} : memref<8x8x128xf32, #tpu.memory_space<vmem>>, vector<1x8x128xf32>,
    %c1_i32_86 = arith.constant 1 : i32
    %136 = arith.index_cast %c1_i32_86 : i32 to index
    %c0_87 = arith.constant 0 : index
    %c0_88 = arith.constant 0 : index
    %137 = vector.load %arg9[%136, %c0_87, %c0_88] : memref<8x8x128xf32, #tpu.memory_space<vmem>>, vector<1x8x128xf32>
    %138 = vector.shape_cast %137 : vector<1x8x128xf32> to vector<8x128xf32>
    %139 = arith.truncf %131 : vector<8x128xf32> to vector<8x128xbf16>
    %cst_89 = arith.constant dense<0.000000e+00> : vector<8x128xf32>
    %140 = tpu.matmul %139, %122, %cst_89 {dimension_numbers = #tpu.dot_dimension_numbers<[1], [0], [0], [1], [0, 0, 1, 1], [], []>} : vector<8x128xbf16>, vector<128x128xbf16>, vector<8x128xf32> -> vector<8x128xf32>
    %141 = arith.addf %138, %140 : vector<8x128xf32>
    %142 = math.tanh %141 : vector<8x128xf32>
    %143 = arith.index_cast %c1_i32_86 : i32 to index
    %c0_90 = arith.constant 0 : index
    %c0_91 = arith.constant 0 : index
    %144 = vector.load %arg9[%143, %c0_90, %c0_91] : memref<8x8x128xf32, #tpu.memory_space<vmem>>, vector<1x8x128xf32>
    %145 = vector.shape_cast %144 : vector<1x8x128xf32> to vector<8x128xf32>
    %146 = vector.shape_cast %142 : vector<8x128xf32> to vector<1x8x128xf32>
    tpu.vector_store %arg9[%143, %c0_90, %c0_91], %146 {strides = array<i32>} : memref<8x8x128xf32, #tpu.memory_space<vmem>>, vector<1x8x128xf32>,
    %c2_i32_92 = arith.constant 2 : i32
    %147 = arith.index_cast %c2_i32_92 : i32 to index
    %c0_93 = arith.constant 0 : index
    %c0_94 = arith.constant 0 : index
    %148 = vector.load %arg9[%147, %c0_93, %c0_94] : memref<8x8x128xf32, #tpu.memory_space<vmem>>, vector<1x8x128xf32>
    %149 = vector.shape_cast %148 : vector<1x8x128xf32> to vector<8x128xf32>
    %150 = arith.truncf %142 : vector<8x128xf32> to vector<8x128xbf16>
    %cst_95 = arith.constant dense<0.000000e+00> : vector<8x128xf32>
    %151 = tpu.matmul %150, %122, %cst_95 {dimension_numbers = #tpu.dot_dimension_numbers<[1], [0], [0], [1], [0, 0, 1, 1], [], []>} : vector<8x128xbf16>, vector<128x128xbf16>, vector<8x128xf32> -> vector<8x128xf32>
    %152 = arith.addf %149, %151 : vector<8x128xf32>
    %153 = math.tanh %152 : vector<8x128xf32>
    %154 = arith.index_cast %c2_i32_92 : i32 to index
    %c0_96 = arith.constant 0 : index
    %c0_97 = arith.constant 0 : index
    %155 = vector.load %arg9[%154, %c0_96, %c0_97] : memref<8x8x128xf32, #tpu.memory_space<vmem>>, vector<1x8x128xf32>
    %156 = vector.shape_cast %155 : vector<1x8x128xf32> to vector<8x128xf32>
    %157 = vector.shape_cast %153 : vector<8x128xf32> to vector<1x8x128xf32>
    tpu.vector_store %arg9[%154, %c0_96, %c0_97], %157 {strides = array<i32>} : memref<8x8x128xf32, #tpu.memory_space<vmem>>, vector<1x8x128xf32>,
    %c3_i32_98 = arith.constant 3 : i32
    %158 = arith.index_cast %c3_i32_98 : i32 to index
    %c0_99 = arith.constant 0 : index
    %c0_100 = arith.constant 0 : index
    %159 = vector.load %arg9[%158, %c0_99, %c0_100] : memref<8x8x128xf32, #tpu.memory_space<vmem>>, vector<1x8x128xf32>
    %160 = vector.shape_cast %159 : vector<1x8x128xf32> to vector<8x128xf32>
    %161 = arith.truncf %153 : vector<8x128xf32> to vector<8x128xbf16>
    %cst_101 = arith.constant dense<0.000000e+00> : vector<8x128xf32>
    %162 = tpu.matmul %161, %122, %cst_101 {dimension_numbers = #tpu.dot_dimension_numbers<[1], [0], [0], [1], [0, 0, 1, 1], [], []>} : vector<8x128xbf16>, vector<128x128xbf16>, vector<8x128xf32> -> vector<8x128xf32>
    %163 = arith.addf %160, %162 : vector<8x128xf32>
    %164 = math.tanh %163 : vector<8x128xf32>
    %165 = arith.index_cast %c3_i32_98 : i32 to index
    %c0_102 = arith.constant 0 : index
    %c0_103 = arith.constant 0 : index
    %166 = vector.load %arg9[%165, %c0_102, %c0_103] : memref<8x8x128xf32, #tpu.memory_space<vmem>>, vector<1x8x128xf32>
    %167 = vector.shape_cast %166 : vector<1x8x128xf32> to vector<8x128xf32>
    %168 = vector.shape_cast %164 : vector<8x128xf32> to vector<1x8x128xf32>
    tpu.vector_store %arg9[%165, %c0_102, %c0_103], %168 {strides = array<i32>} : memref<8x8x128xf32, #tpu.memory_space<vmem>>, vector<1x8x128xf32>,
    %c4_i32_104 = arith.constant 4 : i32
    %169 = arith.index_cast %c4_i32_104 : i32 to index
    %c0_105 = arith.constant 0 : index
    %c0_106 = arith.constant 0 : index
    %170 = vector.load %arg9[%169, %c0_105, %c0_106] : memref<8x8x128xf32, #tpu.memory_space<vmem>>, vector<1x8x128xf32>
    %171 = vector.shape_cast %170 : vector<1x8x128xf32> to vector<8x128xf32>
    %172 = arith.truncf %164 : vector<8x128xf32> to vector<8x128xbf16>
    %cst_107 = arith.constant dense<0.000000e+00> : vector<8x128xf32>
    %173 = tpu.matmul %172, %122, %cst_107 {dimension_numbers = #tpu.dot_dimension_numbers<[1], [0], [0], [1], [0, 0, 1, 1], [], []>} : vector<8x128xbf16>, vector<128x128xbf16>, vector<8x128xf32> -> vector<8x128xf32>
    %174 = arith.addf %171, %173 : vector<8x128xf32>
    %175 = math.tanh %174 : vector<8x128xf32>
    %176 = arith.index_cast %c4_i32_104 : i32 to index
    %c0_108 = arith.constant 0 : index
    %c0_109 = arith.constant 0 : index
    %177 = vector.load %arg9[%176, %c0_108, %c0_109] : memref<8x8x128xf32, #tpu.memory_space<vmem>>, vector<1x8x128xf32>
    %178 = vector.shape_cast %177 : vector<1x8x128xf32> to vector<8x128xf32>
    %179 = vector.shape_cast %175 : vector<8x128xf32> to vector<1x8x128xf32>
    tpu.vector_store %arg9[%176, %c0_108, %c0_109], %179 {strides = array<i32>} : memref<8x8x128xf32, #tpu.memory_space<vmem>>, vector<1x8x128xf32>,
    %c5_i32_110 = arith.constant 5 : i32
    %180 = arith.index_cast %c5_i32_110 : i32 to index
    %c0_111 = arith.constant 0 : index
    %c0_112 = arith.constant 0 : index
    %181 = vector.load %arg9[%180, %c0_111, %c0_112] : memref<8x8x128xf32, #tpu.memory_space<vmem>>, vector<1x8x128xf32>
    %182 = vector.shape_cast %181 : vector<1x8x128xf32> to vector<8x128xf32>
    %183 = arith.truncf %175 : vector<8x128xf32> to vector<8x128xbf16>
    %cst_113 = arith.constant dense<0.000000e+00> : vector<8x128xf32>
    %184 = tpu.matmul %183, %122, %cst_113 {dimension_numbers = #tpu.dot_dimension_numbers<[1], [0], [0], [1], [0, 0, 1, 1], [], []>} : vector<8x128xbf16>, vector<128x128xbf16>, vector<8x128xf32> -> vector<8x128xf32>
    %185 = arith.addf %182, %184 : vector<8x128xf32>
    %186 = math.tanh %185 : vector<8x128xf32>
    %187 = arith.index_cast %c5_i32_110 : i32 to index
    %c0_114 = arith.constant 0 : index
    %c0_115 = arith.constant 0 : index
    %188 = vector.load %arg9[%187, %c0_114, %c0_115] : memref<8x8x128xf32, #tpu.memory_space<vmem>>, vector<1x8x128xf32>
    %189 = vector.shape_cast %188 : vector<1x8x128xf32> to vector<8x128xf32>
    %190 = vector.shape_cast %186 : vector<8x128xf32> to vector<1x8x128xf32>
    tpu.vector_store %arg9[%187, %c0_114, %c0_115], %190 {strides = array<i32>} : memref<8x8x128xf32, #tpu.memory_space<vmem>>, vector<1x8x128xf32>,
    %c6_i32_116 = arith.constant 6 : i32
    %191 = arith.index_cast %c6_i32_116 : i32 to index
    %c0_117 = arith.constant 0 : index
    %c0_118 = arith.constant 0 : index
    %192 = vector.load %arg9[%191, %c0_117, %c0_118] : memref<8x8x128xf32, #tpu.memory_space<vmem>>, vector<1x8x128xf32>
    %193 = vector.shape_cast %192 : vector<1x8x128xf32> to vector<8x128xf32>
    %194 = arith.truncf %186 : vector<8x128xf32> to vector<8x128xbf16>
    %cst_119 = arith.constant dense<0.000000e+00> : vector<8x128xf32>
    %195 = tpu.matmul %194, %122, %cst_119 {dimension_numbers = #tpu.dot_dimension_numbers<[1], [0], [0], [1], [0, 0, 1, 1], [], []>} : vector<8x128xbf16>, vector<128x128xbf16>, vector<8x128xf32> -> vector<8x128xf32>
    %196 = arith.addf %193, %195 : vector<8x128xf32>
    %197 = math.tanh %196 : vector<8x128xf32>
    %198 = arith.index_cast %c6_i32_116 : i32 to index
    %c0_120 = arith.constant 0 : index
    %c0_121 = arith.constant 0 : index
    %199 = vector.load %arg9[%198, %c0_120, %c0_121] : memref<8x8x128xf32, #tpu.memory_space<vmem>>, vector<1x8x128xf32>
    %200 = vector.shape_cast %199 : vector<1x8x128xf32> to vector<8x128xf32>
    %201 = vector.shape_cast %197 : vector<8x128xf32> to vector<1x8x128xf32>
    tpu.vector_store %arg9[%198, %c0_120, %c0_121], %201 {strides = array<i32>} : memref<8x8x128xf32, #tpu.memory_space<vmem>>, vector<1x8x128xf32>,
    %c7_i32_122 = arith.constant 7 : i32
    %202 = arith.index_cast %c7_i32_122 : i32 to index
    %c0_123 = arith.constant 0 : index
    %c0_124 = arith.constant 0 : index
    %203 = vector.load %arg9[%202, %c0_123, %c0_124] : memref<8x8x128xf32, #tpu.memory_space<vmem>>, vector<1x8x128xf32>
    %204 = vector.shape_cast %203 : vector<1x8x128xf32> to vector<8x128xf32>
    %205 = arith.truncf %197 : vector<8x128xf32> to vector<8x128xbf16>
    %cst_125 = arith.constant dense<0.000000e+00> : vector<8x128xf32>
    %206 = tpu.matmul %205, %122, %cst_125 {dimension_numbers = #tpu.dot_dimension_numbers<[1], [0], [0], [1], [0, 0, 1, 1], [], []>} : vector<8x128xbf16>, vector<128x128xbf16>, vector<8x128xf32> -> vector<8x128xf32>
    %207 = arith.addf %204, %206 : vector<8x128xf32>
    %208 = math.tanh %207 : vector<8x128xf32>
    %209 = arith.index_cast %c7_i32_122 : i32 to index
    %c0_126 = arith.constant 0 : index
    %c0_127 = arith.constant 0 : index
    %210 = vector.load %arg9[%209, %c0_126, %c0_127] : memref<8x8x128xf32, #tpu.memory_space<vmem>>, vector<1x8x128xf32>
    %211 = vector.shape_cast %210 : vector<1x8x128xf32> to vector<8x128xf32>
    %212 = vector.shape_cast %208 : vector<8x128xf32> to vector<1x8x128xf32>
    tpu.vector_store %arg9[%209, %c0_126, %c0_127], %212 {strides = array<i32>} : memref<8x8x128xf32, #tpu.memory_space<vmem>>, vector<1x8x128xf32>,
    %c8_i32_128 = arith.constant 8 : i32
    %c1_129 = arith.constant 1 : index
    %c0_130 = arith.constant 0 : index
    %c0_131 = arith.constant 0 : index
    %213 = vector.load %arg8[%c1_129, %c0_130, %c0_131] : memref<2x8x128xf32, #tpu.memory_space<vmem>>, vector<1x8x128xf32>
    %214 = vector.shape_cast %213 : vector<1x8x128xf32> to vector<8x128xf32>
    %215 = vector.shape_cast %208 : vector<8x128xf32> to vector<1x8x128xf32>
    tpu.vector_store %arg8[%c1_129, %c0_130, %c0_131], %215 {strides = array<i32>} : memref<2x8x128xf32, #tpu.memory_space<vmem>>, vector<1x8x128xf32>,
    %c0_i32_132 = arith.constant 0 : i32
    %216 = arith.cmpi eq, %arg1, %c0_i32_132 : i32
    %217 = arith.extui %216 : i1 to i32
    %c0_i32_133 = arith.constant 0 : i32
    %218 = arith.cmpi ne, %217, %c0_i32_133 : i32
    scf.if %218 {
      %c0_134 = arith.constant 0 : index
      %c0_135 = arith.constant 0 : index
      %c0_136 = arith.constant 0 : index
      %219 = vector.load %arg6[%c0_134, %c0_135, %c0_136] : memref<2x8x128xf32, #tpu.memory_space<vmem>>, vector<2x8x128xf32>
      %cst_137 = arith.constant 3.000000e-01 : f32
      %220 = vector.broadcast %cst_137 : f32 to vector<2x8x128xf32>
      %221 = arith.mulf %220, %219 : vector<2x8x128xf32>
      %c0_138 = arith.constant 0 : index
      %c0_139 = arith.constant 0 : index
      %c0_140 = arith.constant 0 : index
      %222 = vector.load %arg8[%c0_138, %c0_139, %c0_140] : memref<2x8x128xf32, #tpu.memory_space<vmem>>, vector<2x8x128xf32>
      %cst_141 = arith.constant 0.699999988 : f32
      %223 = vector.broadcast %cst_141 : f32 to vector<2x8x128xf32>
      %224 = arith.mulf %223, %222 : vector<2x8x128xf32>
      %225 = arith.addf %221, %224 : vector<2x8x128xf32>
      %c0_142 = arith.constant 0 : index
      %c0_143 = arith.constant 0 : index
      %c0_144 = arith.constant 0 : index
      %226 = vector.load %arg7[%c0_142, %c0_143, %c0_144] : memref<2x8x128xf32, #tpu.memory_space<vmem>>, vector<2x8x128xf32>
      tpu.vector_store %arg7[%c0_142, %c0_143, %c0_144], %225 {strides = array<i32>} : memref<2x8x128xf32, #tpu.memory_space<vmem>>, vector<2x8x128xf32>,
    } else {
    }
    return
  }
  func.func @transform_0(%arg0: i32, %arg1: i32) -> (i32, i32, i32) {
    %c0_i32 = arith.constant 0 : i32
    %c0_i32_0 = arith.constant 0 : i32
    return %arg1, %arg0, %c0_i32 : i32, i32, i32
  }
  func.func @transform_1(%arg0: i32, %arg1: i32) -> (i32, i32, i32) {
    %c0_i32 = arith.constant 0 : i32
    %c0_i32_0 = arith.constant 0 : i32
    %c0_i32_1 = arith.constant 0 : i32
    %c0_i32_2 = arith.constant 0 : i32
    return %c0_i32, %c0_i32_0, %c0_i32_1 : i32, i32, i32
  }
  func.func @transform_2(%arg0: i32, %arg1: i32) -> (i32, i32, i32) {
    %c0_i32 = arith.constant 0 : i32
    %c0_i32_0 = arith.constant 0 : i32
    %c0_i32_1 = arith.constant 0 : i32
    %c0_i32_2 = arith.constant 0 : i32
    return %c0_i32, %c0_i32_0, %c0_i32_1 : i32, i32, i32
  }
  func.func @transform_3(%arg0: i32, %arg1: i32) -> (i32, i32, i32) {
    %c0_i32 = arith.constant 0 : i32
    %c0_i32_0 = arith.constant 0 : i32
    %c0_i32_1 = arith.constant 0 : i32
    %c0_i32_2 = arith.constant 0 : i32
    return %c0_i32, %c0_i32_0, %c0_i32_1 : i32, i32, i32
  }
  func.func @transform_4(%arg0: i32, %arg1: i32) -> (i32, i32, i32) {
    %c0_i32 = arith.constant 0 : i32
    %c0_i32_0 = arith.constant 0 : i32
    %c0_i32_1 = arith.constant 0 : i32
    return %c0_i32, %arg0, %c0_i32_0 : i32, i32, i32
  }
  func.func @transform_5(%arg0: i32, %arg1: i32) -> (i32, i32, i32) {
    %c0_i32 = arith.constant 0 : i32
    %c0_i32_0 = arith.constant 0 : i32
    %c0_i32_1 = arith.constant 0 : i32
    return %c0_i32, %arg0, %c0_i32_0 : i32, i32, i32
  }
}

</mosaic_0001>

<bundles_post_ra>
// kernel: tpu_custom_call.1
= control target key start
LH: loop header
LB: loop body
LE: loop exit
PB: predicated region body
PF: predicated region fallthrough
CT: control target
= control target key end

     0   :  { %10 = vsyncpa [#allocation5], 0  ;;  %s1391_s0 = inlined_call_operand.hbm [shape: bf16[8,8,128], index: 0, kind: input, shape index: {}]   ;;  %s1392_s1 = inlined_call_operand.hbm [shape: bf16[2,128,128], index: 1, kind: input, shape index: {}]   ;;  %s1393_s2 = inlined_call_operand.hbm [shape: bf16[2,128,128], index: 2, kind: input, shape index: {}]   ;;  %s1394_s3 = inlined_call_operand.vmem [shape: f32[2,1,128], index: 3, kind: input, shape index: {}]   ;;  %s1395_s4 = inlined_call_operand.hbm [shape: f32[2,8,128], index: 4, kind: input, shape index: {}]   ;;  %s1396_s5 = inlined_call_operand.hbm [shape: f32[2,8,128], index: 5, kind: output, shape index: {}]  }
   0x1   :  { %11 = vsyncpa [#allocation8], 0 }
   0x2   :  { %12 = vsyncpa [#allocation11], 0 }
   0x3   :  { %13 = vsyncpa [#allocation6], 0  ;;  %s31_s20 = sshll.u32 %s1392_s1, 4  ;;  %s1165_s21 = smov [#allocation7]   ;;  %s32_s20 = int_to_ptr.hbm [resolvable:$true] %s31_s20 }
   0x4   :  { %s33_s22 = sshll.u32 %s1165_s21, 4  ;;  %s18_s25 = sshll.u32 %s1391_s0, 4  ;;  %s34_s22 = int_to_ptr.vmem [resolvable:$true] %s33_s22  ;;  %s19_s25 = int_to_ptr.hbm [resolvable:$true] %s18_s25 }
   0x5   :  { %s1166_s26 = smov 64   ;;  %s1167_s27 = smov 4  }
   0x6   :  { %39 = dma.hbm_to_vmem [thread:$0]  %s32_s20, 2048, %s34_s22, [#allocation8], %s1166_s26, %s1166_s26, %s1167_s27  }
   0x7   :  { %s1168_s28 = smov [#allocation4]   ;;  %s44_s7 = sshll.u32 %s1393_s2, 4  ;;  %s45_s7 = int_to_ptr.hbm [resolvable:$true] %s44_s7 }
   0x8   :  { %s20_s29 = sshll.u32 %s1168_s28, 4  ;;  %s59_s9 = sshll.u32 %s1395_s4, 4  ;;  %s21_s29 = int_to_ptr.vmem [resolvable:$true] %s20_s29  ;;  %s60_s9 = int_to_ptr.hbm [resolvable:$true] %s59_s9 }
   0x9   :  { %26 = dma.hbm_to_vmem [thread:$0]  %s19_s25, 512, %s21_s29, [#allocation5], %s1166_s26, %s1166_s26, %s1167_s27  }
   0xa   :  { %s1169_s10 = smov [#allocation9]   ;;  %s1170_s0 = smov [#allocation10]  }
   0xb   :  { %s46_s11 = sshll.u32 %s1169_s10, 4  ;;  %s61_s12 = sshll.u32 %s1170_s0, 4  ;;  %s47_s11 = int_to_ptr.vmem [resolvable:$true] %s46_s11  ;;  %s62_s12 = int_to_ptr.vmem [resolvable:$true] %s61_s12 }
   0xc   :  { %52 = dma.hbm_to_vmem [thread:$0]  %s45_s7, 2048, %s47_s11, [#allocation8], %s1166_s26, %s1166_s26, %s1167_s27  }
   0xd   :  { %s1171_s13 = smov 128   ;;  %s1172_s14 = smov 8  }
   0xe   :  { %67 = dma.hbm_to_vmem [thread:$0]  %s60_s9, 256, %s62_s12, [#allocation11], %s1171_s13, %s1171_s13, %s1172_s14  }
   0xf   :  { %1157 = dma.done.wait [#allocation5], 512  }
  0x10   :  { %1158 = vsyncadd [#allocation5], 4294966784 }
  0x11   :  { %1159 = dma.done.wait [#allocation8], 4096  }
  0x12   :  { %1160 = vsyncadd [#allocation8], 4294963200 }
  0x13   :  { %1161 = dma.done.wait [#allocation11], 256  }
  0x14   :  { %1162 = vsyncadd [#allocation11], 4294967040  ;;  %v969_v0 = vld [vmem:[#allocation7 + $0x38] sm:$0xff]  ;;  %v968_v2 = vld [vmem:[#allocation7 + $0x30] sm:$0xff]  ;;  %s798_s20 = sshll.u32 %s1396_s5, 4  ;;  %s799_s20 = int_to_ptr.hbm [resolvable:$true] %s798_s20 }
  0x15   :  { %v1219_v1 = vld [vmem:[#allocation9 + $0x38] sm:$0xff]  ;;  %192 = vmatpush.bf16.msra.mxu0 %v969_v0  ;;  %v1222_v3 = vld [vmem:[#allocation9 + $0x30] sm:$0xff]  ;;  %v967_v4 = vld [vmem:[#allocation7 + $0x28] sm:$0xff] }
  0x16   :  { %296 = vmatpush.bf16.msra.mxu1 %v1219_v1  ;;  %315 = vmatpush.bf16.msra.mxu2 %v1219_v1  ;;  %v1227_v5 = vld [vmem:[#allocation9 + $0x28] sm:$0xff]  ;;  %v966_v6 = vld [vmem:[#allocation7 + $0x20] sm:$0xff]  ;;  %v965_v8 = vld [vmem:[#allocation7 + $0x18] sm:$0xff] }
  0x17   :  { %334 = vmatpush.bf16.msra.mxu3 %v1219_v1  ;;  %v1232_v7 = vld [vmem:[#allocation9 + $0x20] sm:$0xff]  ;;  %v1237_v9 = vld [vmem:[#allocation9 + $0x18] sm:$0xff]  ;;  %v964_v10 = vld [vmem:[#allocation7 + $0x10] sm:$0xff] }
  0x18   :  { %v972_v11 = vld [vmem:[#allocation9 + $0x10] sm:$0xff]  ;;  %v963_v12 = vld [vmem:[#allocation7 + $0x8] sm:$0xff]  ;;  %v962_v14 = vld [vmem:[#allocation7] sm:$0xff] }
  0x19   :  { %193 = vmatpush.bf16.msra.mxu0 %v968_v2  ;;  %v971_v13 = vld [vmem:[#allocation9 + $0x8] sm:$0xff]  ;;  %v970_v15 = vld [vmem:[#allocation9] sm:$0xff]  ;;  %v985_v35 = vld [vmem:[#allocation7 + $0x78] sm:$0xff] }
  0x1a   :  { %297 = vmatpush.bf16.msra.mxu1 %v1222_v3  ;;  %316 = vmatpush.bf16.msra.mxu2 %v1222_v3  ;;  %v1244_v16 = vld [vmem:[#allocation10] sm:$0xff]  ;;  %v959_v27 = vld [vmem:[#allocation4 + $0x8] sm:$0xff]  ;;  %v984_v43 = vld [vmem:[#allocation7 + $0x70] sm:$0xff] }
  0x1b   :  { %335 = vmatpush.bf16.msra.mxu3 %v1222_v3  ;;  %v958_v17 = vld [vmem:[#allocation4] sm:$0xff]  ;;  %v247_v18 = vpack.c.bf16 %v1244_v16, %v1244_v16  ;;  %v983_v44 = vld [vmem:[#allocation7 + $0x68] sm:$0xff]  ;;  %v960_v45 = vld [vmem:[#allocation4 + $0x10] sm:$0xff] }
  0x1c   :  { %v1276_v19 = vld [vmem:[%s1394_s3] ss:$0 sm:$0xff]  ;;  %v981_v47 = vld [vmem:[#allocation7 + $0x58] sm:$0xff]  ;;  %v980_v48 = vld [vmem:[#allocation7 + $0x50] sm:$0xff] }
  0x1d   :  { %194 = vmatpush.bf16.msra.mxu0 %v967_v4  ;;  %v982_v46 = vld [vmem:[#allocation7 + $0x60] sm:$0xff]  ;;  %v979_v49 = vld [vmem:[#allocation7 + $0x48] sm:$0xff]  ;;  %v1282_v60 = vld [vmem:[#allocation9 + $0x78] sm:$0xff] }
  0x1e   :  { %298 = vmatpush.bf16.msra.mxu1 %v1227_v5  ;;  %317 = vmatpush.bf16.msra.mxu2 %v1227_v5  ;;  %v978_v50 = vld [vmem:[#allocation7 + $0x40] sm:$0xff]  ;;  %v1288_v61 = vld [vmem:[#allocation9 + $0x70] sm:$0xff]  ;;  %v1294_v62 = vld [vmem:[#allocation9 + $0x68] sm:$0xff] }
  0x1f   :  { %336 = vmatpush.bf16.msra.mxu3 %v1227_v5  ;;  %v1300_v63 = vld [vmem:[#allocation9 + $0x60] sm:$0xff]  ;;  %v1306_v0 = vld [vmem:[#allocation9 + $0x58] sm:$0xff]  ;;  %v1315_v2 = vld [vmem:[#allocation9 + $0x48] sm:$0xff] }
  0x21   :  { %195 = vmatpush.bf16.msra.mxu0 %v966_v6 }
  0x22   :  { %299 = vmatpush.bf16.msra.mxu1 %v1232_v7  ;;  %318 = vmatpush.bf16.msra.mxu2 %v1232_v7 }
  0x23   :  { %337 = vmatpush.bf16.msra.mxu3 %v1232_v7 }
  0x25   :  { %196 = vmatpush.bf16.msra.mxu0 %v965_v8 }
  0x26   :  { %300 = vmatpush.bf16.msra.mxu1 %v1237_v9  ;;  %319 = vmatpush.bf16.msra.mxu2 %v1237_v9 }
  0x27   :  { %338 = vmatpush.bf16.msra.mxu3 %v1237_v9 }
  0x29   :  { %197 = vmatpush.bf16.msra.mxu0 %v964_v10  ;;  %v961_v10 = vld [vmem:[#allocation4 + $0x18] sm:$0xff] }
  0x2a   :  { %301 = vmatpush.bf16.msra.mxu1 %v972_v11  ;;  %320 = vmatpush.bf16.msra.mxu2 %v972_v11 }
  0x2b   :  { %339 = vmatpush.bf16.msra.mxu3 %v972_v11 }
  0x2d   :  { %198 = vmatpush.bf16.msra.mxu0 %v963_v12  ;;  %v1333_v12 = vld [vmem:[#allocation10 + $0x8] sm:$0xff] }
  0x2e   :  { %302 = vmatpush.bf16.msra.mxu1 %v971_v13  ;;  %321 = vmatpush.bf16.msra.mxu2 %v971_v13 }
  0x2f   :  { %340 = vmatpush.bf16.msra.mxu3 %v971_v13 }
  0x31   :  { %199 = vmatpush.bf16.msra.mxu0 %v962_v14 }
  0x32   :  { %303 = vmatpush.bf16.msra.mxu1 %v970_v15  ;;  %322 = vmatpush.bf16.msra.mxu2 %v970_v15 }
  0x33   :  { %341 = vmatpush.bf16.msra.mxu3 %v970_v15 }
  0x34   :  { %200 = vmatmul.bf16.vlgmr.msra.gmra.mxu0 %v958_v17 }
  0x35   :  { %304 = vmatmul.bf16.vlgmr.msra.gmra.mxu1 %v247_v18  ;;  %410 = vmatpush.bf16.msrb.mxu0 %v1219_v1 }
  0x36   :  { %353 = vmatpush.bf16.msrb.mxu1 %v1219_v1  ;;  %372 = vmatpush.bf16.msrb.mxu2 %v1219_v1 }
  0x37   :  { %391 = vmatpush.bf16.msrb.mxu3 %v1219_v1 }
  0x39   :  { %411 = vmatpush.bf16.msrb.mxu0 %v1222_v3 }
  0x3a   :  { %354 = vmatpush.bf16.msrb.mxu1 %v1222_v3  ;;  %373 = vmatpush.bf16.msrb.mxu2 %v1222_v3 }
  0x3b   :  { %392 = vmatpush.bf16.msrb.mxu3 %v1222_v3 }
  0x3d   :  { %412 = vmatpush.bf16.msrb.mxu0 %v1227_v5 }
  0x3e   :  { %355 = vmatpush.bf16.msrb.mxu1 %v1227_v5  ;;  %374 = vmatpush.bf16.msrb.mxu2 %v1227_v5 }
  0x3f   :  { %393 = vmatpush.bf16.msrb.mxu3 %v1227_v5 }
  0x41   :  { %413 = vmatpush.bf16.msrb.mxu0 %v1232_v7 }
  0x42   :  { %356 = vmatpush.bf16.msrb.mxu1 %v1232_v7  ;;  %375 = vmatpush.bf16.msrb.mxu2 %v1232_v7 }
  0x43   :  { %394 = vmatpush.bf16.msrb.mxu3 %v1232_v7 }
  0x44   :  { %205 = vmatmul.bf16.gmra.mxu0 %v959_v27 }
  0x45   :  { %414 = vmatpush.bf16.msrb.mxu0 %v1237_v9 }
  0x46   :  { %357 = vmatpush.bf16.msrb.mxu1 %v1237_v9  ;;  %376 = vmatpush.bf16.msrb.mxu2 %v1237_v9 }
  0x47   :  { %395 = vmatpush.bf16.msrb.mxu3 %v1237_v9 }
  0x49   :  { %415 = vmatpush.bf16.msrb.mxu0 %v972_v11 }
  0x4a   :  { %358 = vmatpush.bf16.msrb.mxu1 %v972_v11  ;;  %377 = vmatpush.bf16.msrb.mxu2 %v972_v11 }
  0x4b   :  { %396 = vmatpush.bf16.msrb.mxu3 %v972_v11 }
  0x4d   :  { %416 = vmatpush.bf16.msrb.mxu0 %v971_v13 }
  0x4e   :  { %359 = vmatpush.bf16.msrb.mxu1 %v971_v13  ;;  %378 = vmatpush.bf16.msrb.mxu2 %v971_v13 }
  0x4f   :  { %397 = vmatpush.bf16.msrb.mxu3 %v971_v13 }
  0x51   :  { %417 = vmatpush.bf16.msrb.mxu0 %v970_v15 }
  0x52   :  { %360 = vmatpush.bf16.msrb.mxu1 %v970_v15  ;;  %379 = vmatpush.bf16.msrb.mxu2 %v970_v15 }
  0x53   :  { %398 = vmatpush.bf16.msrb.mxu3 %v970_v15 }
  0x54   :  { %210 = vmatmul.bf16.gmra.mxu0 %v960_v45 }
  0x55   :  { %652 = vmatpush.bf16.msra.mxu0 %v1282_v60 }
  0x56   :  { %429 = vmatpush.bf16.msra.mxu1 %v1219_v1  ;;  %v1312_v1 = vld [vmem:[#allocation9 + $0x50] sm:$0xff] }
  0x59   :  { %653 = vmatpush.bf16.msra.mxu0 %v1288_v61 }
  0x5a   :  { %430 = vmatpush.bf16.msra.mxu1 %v1222_v3  ;;  %v1324_v3 = vld [vmem:[#allocation9 + $0x40] sm:$0xff] }
  0x5d   :  { %654 = vmatpush.bf16.msra.mxu0 %v1294_v62 }
  0x5e   :  { %431 = vmatpush.bf16.msra.mxu1 %v1227_v5 }
  0x61   :  { %655 = vmatpush.bf16.msra.mxu0 %v1300_v63 }
  0x62   :  { %432 = vmatpush.bf16.msra.mxu1 %v1232_v7 }
  0x64   :  { %215 = vmatmul.bf16.gmra.mxu0 %v961_v10 }
  0x65   :  { %656 = vmatpush.bf16.msra.mxu0 %v1306_v0 }
  0x66   :  { %433 = vmatpush.bf16.msra.mxu1 %v1237_v9 }
  0x69   :  { %657 = vmatpush.bf16.msra.mxu0 %v1312_v1 }
  0x6a   :  { %434 = vmatpush.bf16.msra.mxu1 %v972_v11 }
  0x6d   :  { %658 = vmatpush.bf16.msra.mxu0 %v1315_v2 }
  0x6e   :  { %435 = vmatpush.bf16.msra.mxu1 %v971_v13  ;;  %v585_v13 = vpack.c.bf16 %v1333_v12, %v1333_v12 }
  0x71   :  { %659 = vmatpush.bf16.msra.mxu0 %v1324_v3 }
  0x72   :  { %436 = vmatpush.bf16.msra.mxu1 %v970_v15 }
  0xb1   :  { %v201_v20 = vpop.f32.mrf.mxu0 }
  0xb2   :  { %v305_v21 = vpop.f32.mrf.mxu1  ;;  %v202_v22 = vadd.f32 %v1276_v19, %v201_v20 }
  0xb4   :  { %v309_v23 = vadd.f32 %v305_v21, %v202_v22 }
  0xb6   :  { %1005 = vtanh.f32 %v309_v23 }
  0xb9   :  { %v203_v28 = vpop.f32.mrf.mxu0 }
  0xba   :  { %v307_v24 = vpop.f32.mrf.mxu1  ;;  %v204_v29 = vadd.f32 %v1276_v19, %v203_v28 }
  0xbb   :  { %v1355_v24 = vld [vmem:[%s1394_s3 + $0x1] ss:$0 sm:$0xff]  ;;  %s1173_s3 = smov [#allocation12]  }
  0xbc   :  { %v1006_v25 = vpop.eup %1005  ;;  %s796_s17 = sshll.u32 %s1173_s3, 4  ;;  %s797_s17 = int_to_ptr.vmem [resolvable:$true] %s796_s17 }
  0xbd   :  { %v314_v26 = vpack.c.bf16 %v1006_v25, %v1006_v25 }
  0xbf   :  { %323 = vmatmul.bf16.vlgmr.msra.gmra.mxu2 %v314_v26 }
  0xc0   :  { %528 = vmatpush.bf16.msra.mxu2 %v985_v35 }
  0xc1   :  { %v206_v36 = vpop.f32.mrf.mxu0 }
  0xc2   :  { %v207_v37 = vadd.f32 %v1276_v19, %v206_v36 }
  0xc4   :  { %529 = vmatpush.bf16.msra.mxu2 %v984_v43 }
  0xc8   :  { %530 = vmatpush.bf16.msra.mxu2 %v983_v44 }
  0xc9   :  { %v208_v51 = vpop.f32.mrf.mxu0 }
  0xca   :  { %v209_v52 = vadd.f32 %v1276_v19, %v208_v51  ;;  %v782_v51 = vmul.f32 0.3, %v1244_v16 }
  0xcc   :  { %531 = vmatpush.bf16.msra.mxu2 %v982_v46 }
  0xd0   :  { %532 = vmatpush.bf16.msra.mxu2 %v981_v47 }
  0xd1   :  { %v211_v4 = vpop.f32.mrf.mxu0 }
  0xd2   :  { %v212_v5 = vadd.f32 %v1276_v19, %v211_v4 }
  0xd4   :  { %533 = vmatpush.bf16.msra.mxu2 %v980_v48 }
  0xd8   :  { %534 = vmatpush.bf16.msra.mxu2 %v979_v49 }
  0xd9   :  { %v213_v14 = vpop.f32.mrf.mxu0 }
  0xda   :  { %v214_v15 = vadd.f32 %v1276_v19, %v213_v14 }
  0xdc   :  { %535 = vmatpush.bf16.msra.mxu2 %v978_v50 }
 0x142   :  { %v324_v30 = vpop.f32.mrf.mxu2 }
 0x143   :  { %v328_v31 = vadd.f32 %v324_v30, %v204_v29 }
 0x145   :  { %1007 = vtanh.f32 %v328_v31 }
 0x14a   :  { %v326_v32 = vpop.f32.mrf.mxu2 }
 0x14b   :  { %v1008_v33 = vpop.eup %1007  ;;  %v216_v32 = vpop.f32.mrf.mxu0 }
 0x14c   :  { %v333_v34 = vpack.c.bf16 %v1008_v33, %v1008_v33  ;;  %v454_v58 = vpack.c.bf16 %v1008_v33, %v1006_v25 }
 0x14e   :  { %342 = vmatmul.bf16.vlgmr.msra.gmra.mxu3 %v333_v34  ;;  %v217_v34 = vadd.f32 %v1276_v19, %v216_v32 }
 0x14f   :  { %634 = vmatpush.bf16.msra.mxu3 %v1282_v60 }
 0x153   :  { %635 = vmatpush.bf16.msra.mxu3 %v1288_v61  ;;  %v218_v33 = vpop.f32.mrf.mxu0 }
 0x154   :  { %v219_v47 = vadd.f32 %v1276_v19, %v218_v33  ;;  %v783_v33 = vmul.f32 0.3, %v1333_v12 }
 0x157   :  { %636 = vmatpush.bf16.msra.mxu3 %v1294_v62 }
 0x15b   :  { %637 = vmatpush.bf16.msra.mxu3 %v1300_v63 }
 0x15f   :  { %638 = vmatpush.bf16.msra.mxu3 %v1306_v0 }
 0x163   :  { %639 = vmatpush.bf16.msra.mxu3 %v1312_v1 }
 0x167   :  { %640 = vmatpush.bf16.msra.mxu3 %v1315_v2 }
 0x16b   :  { %641 = vmatpush.bf16.msra.mxu3 %v1324_v3 }
 0x1d1   :  { %v343_v38 = vpop.f32.mrf.mxu3 }
 0x1d2   :  { %v347_v39 = vadd.f32 %v343_v38, %v207_v37 }
 0x1d4   :  { %1009 = vtanh.f32 %v347_v39 }
 0x1d9   :  { %v345_v40 = vpop.f32.mrf.mxu3 }
 0x1da   :  { %v1010_v41 = vpop.eup %1009 }
 0x1db   :  { %v352_v42 = vpack.c.bf16 %v1010_v41, %v1010_v41 }
 0x1dd   :  { %361 = vmatmul.bf16.vlgmr.msrb.gmra.mxu1 %v352_v42 }
 0x1de   :  { %670 = vmatpush.bf16.msrb.mxu1 %v1282_v60 }
 0x1e2   :  { %671 = vmatpush.bf16.msrb.mxu1 %v1288_v61 }
 0x1e6   :  { %672 = vmatpush.bf16.msrb.mxu1 %v1294_v62 }
 0x1ea   :  { %673 = vmatpush.bf16.msrb.mxu1 %v1300_v63 }
 0x1ee   :  { %674 = vmatpush.bf16.msrb.mxu1 %v1306_v0 }
 0x1f2   :  { %675 = vmatpush.bf16.msrb.mxu1 %v1312_v1 }
 0x1f6   :  { %676 = vmatpush.bf16.msrb.mxu1 %v1315_v2 }
 0x1fa   :  { %677 = vmatpush.bf16.msrb.mxu1 %v1324_v3 }
 0x25a   :  { %v362_v53 = vpop.f32.mrf.mxu1 }
 0x25b   :  { %v366_v54 = vadd.f32 %v362_v53, %v209_v52 }
 0x25d   :  { %1011 = vtanh.f32 %v366_v54 }
 0x262   :  { %v364_v55 = vpop.f32.mrf.mxu1 }
 0x263   :  { %v1012_v56 = vpop.eup %1011 }
 0x264   :  { %v371_v57 = vpack.c.bf16 %v1012_v56, %v1012_v56  ;;  %v455_v59 = vpack.c.bf16 %v1012_v56, %v1010_v41 }
 0x266   :  { %380 = vmatmul.bf16.vlgmr.msrb.gmra.mxu2 %v371_v57 }
 0x267   :  { %742 = vmatpush.bf16.msrb.mxu2 %v1282_v60 }
 0x26b   :  { %743 = vmatpush.bf16.msrb.mxu2 %v1288_v61 }
 0x26f   :  { %744 = vmatpush.bf16.msrb.mxu2 %v1294_v62 }
 0x273   :  { %745 = vmatpush.bf16.msrb.mxu2 %v1300_v63 }
 0x276   :  { %536 = vmatmul.bf16.vlgmr.msra.gmra.mxu2 %v454_v58 }
 0x277   :  { %746 = vmatpush.bf16.msrb.mxu2 %v1306_v0 }
 0x27b   :  { %747 = vmatpush.bf16.msrb.mxu2 %v1312_v1 }
 0x27f   :  { %748 = vmatpush.bf16.msrb.mxu2 %v1315_v2 }
 0x283   :  { %749 = vmatpush.bf16.msrb.mxu2 %v1324_v3 }
 0x286   :  { %541 = vmatmul.bf16.gmra.mxu2 %v455_v59 }
 0x2e9   :  { %v381_v6 = vpop.f32.mrf.mxu2 }
 0x2ea   :  { %v385_v7 = vadd.f32 %v381_v6, %v212_v5 }
 0x2ec   :  { %1013 = vtanh.f32 %v385_v7 }
 0x2f1   :  { %v383_v8 = vpop.f32.mrf.mxu2 }
 0x2f2   :  { %v1014_v9 = vpop.eup %1013 }
 0x2f3   :  { %v390_v11 = vpack.c.bf16 %v1014_v9, %v1014_v9 }
 0x2f5   :  { %399 = vmatmul.bf16.vlgmr.msrb.gmra.mxu3 %v390_v11 }
 0x2f6   :  { %688 = vmatpush.bf16.msrb.mxu3 %v1282_v60 }
 0x2f9   :  { %v537_v25 = vpop.f32.mrf.mxu2 }
 0x2fa   :  { %689 = vmatpush.bf16.msrb.mxu3 %v1288_v61  ;;  %v538_v26 = vadd.f32 %v1355_v24, %v537_v25 }
 0x2fe   :  { %690 = vmatpush.bf16.msrb.mxu3 %v1294_v62 }
 0x301   :  { %v539_v40 = vpop.f32.mrf.mxu2 }
 0x302   :  { %691 = vmatpush.bf16.msrb.mxu3 %v1300_v63  ;;  %v540_v41 = vadd.f32 %v1355_v24, %v539_v40 }
 0x305   :  { %642 = vmatmul.bf16.vlgmr.msra.gmra.mxu3 %v585_v13 }
 0x306   :  { %692 = vmatpush.bf16.msrb.mxu3 %v1306_v0 }
 0x309   :  { %v542_v55 = vpop.f32.mrf.mxu2 }
 0x30a   :  { %693 = vmatpush.bf16.msrb.mxu3 %v1312_v1  ;;  %v543_v57 = vadd.f32 %v1355_v24, %v542_v55 }
 0x30e   :  { %694 = vmatpush.bf16.msrb.mxu3 %v1315_v2 }
 0x312   :  { %695 = vmatpush.bf16.msrb.mxu3 %v1324_v3 }
 0x316   :  { %760 = vmatpush.bf16.msra.mxu3 %v1282_v60 }
 0x31a   :  { %761 = vmatpush.bf16.msra.mxu3 %v1288_v61 }
 0x31e   :  { %762 = vmatpush.bf16.msra.mxu3 %v1294_v62 }
 0x322   :  { %763 = vmatpush.bf16.msra.mxu3 %v1300_v63 }
 0x326   :  { %764 = vmatpush.bf16.msra.mxu3 %v1306_v0 }
 0x32a   :  { %765 = vmatpush.bf16.msra.mxu3 %v1312_v1 }
 0x32e   :  { %766 = vmatpush.bf16.msra.mxu3 %v1315_v2 }
 0x332   :  { %767 = vmatpush.bf16.msra.mxu3 %v1324_v3 }
 0x378   :  { %v400_v17 = vpop.f32.mrf.mxu3 }
 0x379   :  { %v404_v18 = vadd.f32 %v400_v17, %v214_v15 }
 0x37b   :  { %1015 = vtanh.f32 %v404_v18 }
 0x380   :  { %v402_v20 = vpop.f32.mrf.mxu3 }
 0x381   :  { %v1016_v21 = vpop.eup %1015 }
 0x382   :  { %v409_v22 = vpack.c.bf16 %v1016_v21, %v1016_v21  ;;  %v456_v23 = vpack.c.bf16 %v1016_v21, %v1014_v9 }
 0x384   :  { %418 = vmatmul.bf16.vlgmr.msrb.gmra.mxu0 %v409_v22  ;;  %546 = vmatmul.bf16.gmra.mxu2 %v456_v23 }
 0x385   :  { %706 = vmatpush.bf16.msrb.mxu0 %v1282_v60 }
 0x388   :  { %v643_v27 = vpop.f32.mrf.mxu3 }
 0x389   :  { %v647_v28 = vadd.f32 %v643_v27, %v538_v26  ;;  %707 = vmatpush.bf16.msrb.mxu0 %v1288_v61 }
 0x38b   :  { %1017 = vtanh.f32 %v647_v28 }
 0x38d   :  { %708 = vmatpush.bf16.msrb.mxu0 %v1294_v62 }
 0x390   :  { %v645_v29 = vpop.f32.mrf.mxu3 }
 0x391   :  { %v1018_v30 = vpop.eup %1017  ;;  %709 = vmatpush.bf16.msrb.mxu0 %v1300_v63 }
 0x392   :  { %v651_v31 = vpack.c.bf16 %v1018_v30, %v1018_v30 }
 0x394   :  { %660 = vmatmul.bf16.vlgmr.msra.gmra.mxu0 %v651_v31 }
 0x395   :  { %710 = vmatpush.bf16.msrb.mxu0 %v1306_v0 }
 0x399   :  { %711 = vmatpush.bf16.msrb.mxu0 %v1312_v1 }
 0x39d   :  { %712 = vmatpush.bf16.msrb.mxu0 %v1315_v2 }
 0x3a1   :  { %713 = vmatpush.bf16.msrb.mxu0 %v1324_v3 }
 0x401   :  { %v419_v35 = vpop.f32.mrf.mxu0 }
 0x402   :  { %v423_v36 = vadd.f32 %v419_v35, %v217_v34 }
 0x404   :  { %1019 = vtanh.f32 %v423_v36 }
 0x409   :  { %v421_v37 = vpop.f32.mrf.mxu0 }
 0x40a   :  { %v1020_v38 = vpop.eup %1019 }
 0x40b   :  { %v428_v39 = vpack.c.bf16 %v1020_v38, %v1020_v38 }
 0x40d   :  { %437 = vmatmul.bf16.vlgmr.msra.gmra.mxu1 %v428_v39 }
 0x40e   :  { %724 = vmatpush.bf16.msra.mxu1 %v1282_v60 }
 0x411   :  { %v661_v42 = vpop.f32.mrf.mxu0 }
 0x412   :  { %v665_v43 = vadd.f32 %v661_v42, %v540_v41  ;;  %725 = vmatpush.bf16.msra.mxu1 %v1288_v61 }
 0x414   :  { %1021 = vtanh.f32 %v665_v43 }
 0x416   :  { %726 = vmatpush.bf16.msra.mxu1 %v1294_v62  ;;  %v544_v62 = vpop.f32.mrf.mxu2 }
 0x419   :  { %v663_v44 = vpop.f32.mrf.mxu0 }
 0x41a   :  { %v1022_v45 = vpop.eup %1021  ;;  %727 = vmatpush.bf16.msra.mxu1 %v1300_v63  ;;  %v545_v63 = vadd.f32 %v1355_v24, %v544_v62 }
 0x41b   :  { %v669_v46 = vpack.c.bf16 %v1022_v45, %v1022_v45 }
 0x41d   :  { %678 = vmatmul.bf16.vlgmr.msrb.gmra.mxu1 %v669_v46 }
 0x41e   :  { %728 = vmatpush.bf16.msra.mxu1 %v1306_v0  ;;  %v547_v4 = vpop.f32.mrf.mxu2 }
 0x41f   :  { %v548_v5 = vadd.f32 %v1355_v24, %v547_v4 }
 0x422   :  { %729 = vmatpush.bf16.msra.mxu1 %v1312_v1 }
 0x426   :  { %730 = vmatpush.bf16.msra.mxu1 %v1315_v2  ;;  %v549_v11 = vpop.f32.mrf.mxu2 }
 0x427   :  { %v550_v13 = vadd.f32 %v1355_v24, %v549_v11 }
 0x42a   :  { %731 = vmatpush.bf16.msra.mxu1 %v1324_v3 }
 0x48a   :  { %v438_v48 = vpop.f32.mrf.mxu1 }
 0x48b   :  { %v442_v49 = vadd.f32 %v438_v48, %v219_v47 }
 0x48d   :  { %1023 = vtanh.f32 %v442_v49 }
 0x492   :  { %v440_v50 = vpop.f32.mrf.mxu1 }
 0x493   :  { %v1024_v52 = vpop.eup %1023 }
 0x494   :  { %v786_v53 = vmul.f32 0.7, %v1024_v52  ;;  %v457_v54 = vpack.c.bf16 %v1024_v52, %v1020_v38 }
 0x496   :  { %551 = vmatmul.bf16.gmra.mxu2 %v457_v54  ;;  %v788_v56 = vadd.f32 %v786_v53, %v782_v51 }
 0x498   :  { %790 = vst [vmem:[#allocation12] sm:$0xff] %v788_v56 }
 0x49a   :  { %v679_v58 = vpop.f32.mrf.mxu1 }
 0x49b   :  { %v683_v59 = vadd.f32 %v679_v58, %v543_v57 }
 0x49d   :  { %1025 = vtanh.f32 %v683_v59 }
 0x4a2   :  { %v681_v60 = vpop.f32.mrf.mxu1 }
 0x4a3   :  { %v1026_v19 = vpop.eup %1025 }
 0x4a4   :  { %v687_v61 = vpack.c.bf16 %v1026_v19, %v1026_v19 }
 0x4a6   :  { %696 = vmatmul.bf16.vlgmr.msrb.gmra.mxu3 %v687_v61 }
 0x519   :  { %v552_v21 = vpop.f32.mrf.mxu2 }
 0x51a   :  { %v553_v23 = vadd.f32 %v1355_v24, %v552_v21 }
 0x521   :  { %v554_v22 = vpop.f32.mrf.mxu2 }
 0x522   :  { %v555_v30 = vadd.f32 %v1355_v24, %v554_v22 }
 0x529   :  { %v697_v16 = vpop.f32.mrf.mxu3 }
 0x52a   :  { %v701_v0 = vadd.f32 %v697_v16, %v545_v63 }
 0x52c   :  { %1027 = vtanh.f32 %v701_v0 }
 0x531   :  { %v699_v1 = vpop.f32.mrf.mxu3 }
 0x532   :  { %v1028_v2 = vpop.eup %1027 }
 0x533   :  { %v705_v3 = vpack.c.bf16 %v1028_v2, %v1028_v2 }
 0x535   :  { %714 = vmatmul.bf16.vlgmr.msrb.gmra.mxu0 %v705_v3 }
 0x5b2   :  { %v715_v6 = vpop.f32.mrf.mxu0 }
 0x5b3   :  { %v719_v7 = vadd.f32 %v715_v6, %v548_v5 }
 0x5b5   :  { %1029 = vtanh.f32 %v719_v7 }
 0x5ba   :  { %v717_v8 = vpop.f32.mrf.mxu0 }
 0x5bb   :  { %v1030_v9 = vpop.eup %1029 }
 0x5bc   :  { %v723_v10 = vpack.c.bf16 %v1030_v9, %v1030_v9 }
 0x5be   :  { %732 = vmatmul.bf16.vlgmr.msra.gmra.mxu1 %v723_v10 }
 0x63b   :  { %v733_v14 = vpop.f32.mrf.mxu1 }
 0x63c   :  { %v737_v15 = vadd.f32 %v733_v14, %v550_v13 }
 0x63e   :  { %1031 = vtanh.f32 %v737_v15 }
 0x643   :  { %v735_v17 = vpop.f32.mrf.mxu1 }
 0x644   :  { %v1032_v18 = vpop.eup %1031 }
 0x645   :  { %v741_v20 = vpack.c.bf16 %v1032_v18, %v1032_v18 }
 0x647   :  { %750 = vmatmul.bf16.vlgmr.msrb.gmra.mxu2 %v741_v20 }
 0x6ca   :  { %v751_v25 = vpop.f32.mrf.mxu2 }
 0x6cb   :  { %v755_v26 = vadd.f32 %v751_v25, %v553_v23 }
 0x6cd   :  { %1033 = vtanh.f32 %v755_v26 }
 0x6d2   :  { %v753_v27 = vpop.f32.mrf.mxu2 }
 0x6d3   :  { %v1034_v28 = vpop.eup %1033 }
 0x6d4   :  { %v759_v29 = vpack.c.bf16 %v1034_v28, %v1034_v28 }
 0x6d6   :  { %768 = vmatmul.bf16.vlgmr.msra.gmra.mxu3 %v759_v29 }
 0x759   :  { %v769_v31 = vpop.f32.mrf.mxu3 }
 0x75a   :  { %v773_v32 = vadd.f32 %v769_v31, %v555_v30 }
 0x75c   :  { %1035 = vtanh.f32 %v773_v32 }
 0x761   :  { %v771_v34 = vpop.f32.mrf.mxu3 }
 0x762   :  { %v1036_v35 = vpop.eup %1035 }
 0x763   :  { %v787_v36 = vmul.f32 0.7, %v1036_v35 }
 0x765   :  { %v789_v37 = vadd.f32 %v787_v36, %v783_v33 }
 0x767   :  { %791 = vst [vmem:[#allocation12 + $0x8] sm:$0xff] %v789_v37 }
 0x768   :  { %804 = dma.vmem_to_hbm [thread:$0]  %s797_s17, 256, %s799_s20, [#allocation6], %s1171_s13, %s1171_s13, %s1172_s14  }
 0x769   :  { %1163 = dma.done.wait [#allocation6], 256  }
 0x76a   :  { %1164 = vsyncadd [#allocation6], 4294967040 }
 0x76b   :  { %809 = vsyncpa [#allocation5], 1 }
 0x76c   :  { %810 = vsyncpa [#allocation8], 1 }
 0x76d   :  { %811 = vsyncpa [#allocation11], 1 }
 0x76e   :  { %812 = vsyncpa [#allocation6], 1 }

</bundles_post_ra>
